<compile_context>
chip_gen: v7x
topology: tpu7x:2x2x1
jax: 0.10.0
libtpu: 0.0.40
codegen_flags: <defaults>
</compile_context>

<pallas_src>
import functools
import math

import jax
import jax.numpy as jnp
from jax.experimental import pallas as pl
from jax.experimental.pallas import tpu as pltpu


def _fused_mlp_kernel(*refs, n_layers, batch, hidden_dtype):
    """refs = (x, w0, b0, w1, b1, ..., o, xpad_scratch).

    x_ref:  (B, D_in) f32 (unpadded, straight from the wrapper)
    w_i:    (K_i, N_i) bf16;  b_i: (1, N_i) f32
    o_ref:  (B, D_out) f32 (only the real rows are ever stored)
    xpad:   (Bp, D_in) f32 VMEM scratch used for in-kernel batch padding.
    """
    x_ref = refs[0]
    o_ref = refs[-2]
    xpad_ref = refs[-1]

    pad_batch = xpad_ref.shape[0]
    # In-kernel batch pad (replaces the old wrapper-side jnp.pad HLO): zero the
    # (Bp, D_in) scratch once, then drop the B real rows in (masked sublane
    # store).  Padded rows are never read back out.
    if batch < pad_batch:
        xpad_ref[...] = jnp.zeros_like(xpad_ref)
    xpad_ref[:batch, :] = x_ref[...]

    h = xpad_ref[...]  # (Bp, D_in) f32
    for i in range(n_layers):
        w_ref = refs[1 + 2 * i]
        b_ref = refs[2 + 2 * i]
        # bf16 x bf16 MXU matmul with f32 accumulation.
        y = jnp.dot(h.astype(jnp.bfloat16), w_ref[...],
                    preferred_element_type=jnp.float32)
        y = y + b_ref[...]                     # f32 bias add, broadcast (1, N)
        if i < n_layers - 1:
            # Hidden ReLU: bf16 on v6e/v7x (native bf16 VPU), f32 on v5e
            # (no bf16 VPU there, bf16 elementwise would just unpack).
            h = jnp.maximum(y.astype(hidden_dtype), 0)
        else:
            # sigmoid(y) == 0.5*tanh(0.5*y) + 0.5 : keeps the divide off the
            # VALU and puts the transcendental on the EUP slot.
            h = 0.5 * jnp.tanh(0.5 * y) + 0.5

    # Store only the B real rows: lane-dense (D_out multiple of 128) so the
    # store is an unmasked-lane vst with a cheap B-row sublane mask; the
    # wrapper needs no out[:B] slice afterwards.
    o_ref[...] = h[:batch].astype(o_ref.dtype)


def _hidden_act_dtype():
    """bf16 hidden activations on chips with a bf16 VPU (v6e/v7x), f32 otherwise."""
    try:
        kind = jax.devices()[0].device_kind.lower()
    except Exception:
        return jnp.float32
    if "v6" in kind or "v7" in kind:
        return jnp.bfloat16
    return jnp.float32


def init_ffdecoder_params(key, layers, output_size, input_size):
    """Deterministic parameter init mirroring nn.Linear's default
    U(-1/sqrt(fan_in), 1/sqrt(fan_in)). Weights stored as (in, out) bf16,
    biases as (1, out) f32."""
    try:
        input_flattened = input_size[0] * input_size[1]
    except TypeError:
        input_flattened = input_size
    output_flattened = output_size[0] * output_size[1] * output_size[2]

    dims_in = [input_flattened] + list(layers)
    dims_out = list(layers) + [output_flattened]

    params = []
    for d_in, d_out in zip(dims_in, dims_out):
        key, kw, kb = jax.random.split(key, 3)
        bound = 1.0 / math.sqrt(d_in)
        w = jax.random.uniform(kw, (d_in, d_out), jnp.float32, -bound, bound)
        b = jax.random.uniform(kb, (1, d_out), jnp.float32, -bound, bound)
        params.append((w.astype(jnp.bfloat16), b))
    return params


def ffdecoder_forward(x, params, output_size):
    """x: (B, num_capsules, capsule_dim) or (B, D_in). Returns (B, C, H, W)."""
    B = x.shape[0]
    h = x.reshape(B, -1).astype(jnp.float32)   # contiguous reshape: metadata only
    D_in = h.shape[1]

    n_layers = len(params)
    D_out = params[-1][0].shape[1]

    # Batch padding to the bf16 sublane-pack minimum (16 rows) happens inside
    # the kernel via a VMEM scratch; never pad further (only wastes FLOPs).
    Bp = max(16, ((B + 15) // 16) * 16)

    flat_params = []
    for (w, b) in params:
        flat_params.extend([w, b])

    flops = 2 * B * sum(int(w.shape[0]) * int(w.shape[1]) for (w, _) in params)
    bytes_accessed = (
        h.size * 4
        + sum(w.size * w.dtype.itemsize + b.size * b.dtype.itemsize
              for (w, b) in params)
        + B * D_out * 4
    )
    transcendentals = B * D_out  # final sigmoid (tanh on the EUP)

    vmem_spec = pl.BlockSpec(memory_space=pltpu.MemorySpace.VMEM)
    kernel = functools.partial(
        _fused_mlp_kernel,
        n_layers=n_layers,
        batch=B,
        hidden_dtype=_hidden_act_dtype(),
    )

    # TODO(synk): if the decoder ever runs at large batch, add a grid over M
    # (128-256 row blocks, dimension_semantics=("parallel",)) to shard across
    # v7x's 2 TensorCores; at B~2 a grid would only add per-step overhead.
    # TODO(synk): on v5e only, if the serial ~0.6 MB weight-prologue DMA shows
    # up in profiles, move later-layer weights to memory_space=pl.ANY and
    # overlap their make_async_copy with the layer-1 matmul.
    out = pl.pallas_call(
        kernel,
        out_shape=jax.ShapeDtypeStruct((B, D_out), jnp.float32),
        in_specs=[vmem_spec] * (1 + 2 * n_layers),
        out_specs=vmem_spec,
        scratch_shapes=[pltpu.VMEM((Bp, D_in), jnp.float32)],
        cost_estimate=pl.CostEstimate(
            flops=flops,
            transcendentals=transcendentals,
            bytes_accessed=bytes_accessed,
        ),
    )(h, *flat_params)

    C, H, W = output_size
    return out.reshape(B, C, H, W)


def ffdecoder_reference(x, params, output_size):
    """Plain-JAX reference (same bf16 rounding of weights and of every matmul
    input as the kernel; f32 accumulation)."""
    B = x.shape[0]
    h = x.reshape(B, -1).astype(jnp.float32)
    n_layers = len(params)
    for i, (w, b) in enumerate(params):
        h_bf = h.astype(jnp.bfloat16).astype(jnp.float32)
        y = h_bf @ w.astype(jnp.float32) + b
        h = jnp.maximum(y, 0.0) if i < n_layers - 1 else jax.nn.sigmoid(y)
    C, H, W = output_size
    return h.reshape(B, C, H, W)


if __name__ == "__main__":
    # Small, TPU-tile-friendly shapes:
    #   capsules: (8 capsules, 16 dims) -> D_in = 128
    #   hidden layers: [256, 512]
    #   output image: (4, 8, 8) -> D_out = 256
    batch = 2
    input_size = (8, 16)
    hidden_layers = [256, 512]
    output_size = (4, 8, 8)

    key = jax.random.PRNGKey(0)
    key, kx = jax.random.split(key)
    x = jax.random.normal(kx, (batch, input_size[0], input_size[1]), jnp.float32)

    params = init_ffdecoder_params(key, hidden_layers, output_size, input_size)

    out = ffdecoder_forward(x, params, output_size)
    out = jax.block_until_ready(out)

    ref = ffdecoder_reference(x, params, output_size)
    assert out.shape == (batch,) + output_size, out.shape
    assert jnp.allclose(out, ref, atol=1e-4, rtol=1e-4), "mismatch vs reference"

    print("KERNEL_OK")
</pallas_src>

<mosaic_0001>
module attributes {stable_mosaic.version = 11 : i64} {
  func.func @_fused_mlp_kernel(%arg0: memref<2x128xf32, #tpu.memory_space<vmem>>, %arg1: memref<128x256xbf16, #tpu.memory_space<vmem>>, %arg2: memref<1x256xf32, #tpu.memory_space<vmem>>, %arg3: memref<256x512xbf16, #tpu.memory_space<vmem>>, %arg4: memref<1x512xf32, #tpu.memory_space<vmem>>, %arg5: memref<512x256xbf16, #tpu.memory_space<vmem>>, %arg6: memref<1x256xf32, #tpu.memory_space<vmem>>, %arg7: memref<2x256xf32, #tpu.memory_space<vmem>>, %arg8: memref<16x128xf32, #tpu.memory_space<vmem>>) attributes {dimension_semantics = [], scalar_prefetch = 0 : i64, scratch_operands = 1 : i64, tpu.core_type = #tpu.core_type<tc>} {
    %cst = arith.constant 0.000000e+00 : f32
    %0 = vector.broadcast %cst : f32 to vector<16x128xf32>
    %c0 = arith.constant 0 : index
    %c0_0 = arith.constant 0 : index
    %1 = vector.load %arg8[%c0, %c0_0] : memref<16x128xf32, #tpu.memory_space<vmem>>, vector<16x128xf32>
    tpu.vector_store %arg8[%c0, %c0_0], %0 {strides = array<i32>} : memref<16x128xf32, #tpu.memory_space<vmem>>, vector<16x128xf32>,
    %c0_1 = arith.constant 0 : index
    %c0_2 = arith.constant 0 : index
    %2 = vector.load %arg0[%c0_1, %c0_2] : memref<2x128xf32, #tpu.memory_space<vmem>>, vector<2x128xf32>
    %c0_3 = arith.constant 0 : index
    %c0_4 = arith.constant 0 : index
    %3 = vector.load %arg8[%c0_3, %c0_4] : memref<16x128xf32, #tpu.memory_space<vmem>>, vector<2x128xf32>
    tpu.vector_store %arg8[%c0_3, %c0_4], %2 {strides = array<i32>} : memref<16x128xf32, #tpu.memory_space<vmem>>, vector<2x128xf32>,
    %c0_5 = arith.constant 0 : index
    %c0_6 = arith.constant 0 : index
    %4 = vector.load %arg8[%c0_5, %c0_6] : memref<16x128xf32, #tpu.memory_space<vmem>>, vector<16x128xf32>
    %5 = arith.truncf %4 : vector<16x128xf32> to vector<16x128xbf16>
    %c0_7 = arith.constant 0 : index
    %c0_8 = arith.constant 0 : index
    %6 = vector.load %arg1[%c0_7, %c0_8] : memref<128x256xbf16, #tpu.memory_space<vmem>>, vector<128x256xbf16>
    %cst_9 = arith.constant dense<0.000000e+00> : vector<16x256xf32>
    %7 = tpu.matmul %5, %6, %cst_9 {dimension_numbers = #tpu.dot_dimension_numbers<[1], [0], [0], [1], [0, 0, 1, 1], [], []>} : vector<16x128xbf16>, vector<128x256xbf16>, vector<16x256xf32> -> vector<16x256xf32>
    %c0_10 = arith.constant 0 : index
    %c0_11 = arith.constant 0 : index
    %8 = vector.load %arg2[%c0_10, %c0_11] : memref<1x256xf32, #tpu.memory_space<vmem>>, vector<1x256xf32>
    %9 = vector.broadcast %8 : vector<1x256xf32> to vector<16x256xf32>
    %10 = arith.addf %7, %9 : vector<16x256xf32>
    %cst_12 = arith.constant 0.000000e+00 : f32
    %11 = vector.broadcast %cst_12 : f32 to vector<16x256xf32>
    %12 = arith.maximumf %10, %11 : vector<16x256xf32>
    %13 = arith.truncf %12 : vector<16x256xf32> to vector<16x256xbf16>
    %c0_13 = arith.constant 0 : index
    %c0_14 = arith.constant 0 : index
    %14 = vector.load %arg3[%c0_13, %c0_14] : memref<256x512xbf16, #tpu.memory_space<vmem>>, vector<256x512xbf16>
    %cst_15 = arith.constant dense<0.000000e+00> : vector<16x512xf32>
    %15 = tpu.matmul %13, %14, %cst_15 {dimension_numbers = #tpu.dot_dimension_numbers<[1], [0], [0], [1], [0, 0, 1, 1], [], []>} : vector<16x256xbf16>, vector<256x512xbf16>, vector<16x512xf32> -> vector<16x512xf32>
    %c0_16 = arith.constant 0 : index
    %c0_17 = arith.constant 0 : index
    %16 = vector.load %arg4[%c0_16, %c0_17] : memref<1x512xf32, #tpu.memory_space<vmem>>, vector<1x512xf32>
    %17 = vector.broadcast %16 : vector<1x512xf32> to vector<16x512xf32>
    %18 = arith.addf %15, %17 : vector<16x512xf32>
    %cst_18 = arith.constant 0.000000e+00 : f32
    %19 = vector.broadcast %cst_18 : f32 to vector<16x512xf32>
    %20 = arith.maximumf %18, %19 : vector<16x512xf32>
    %21 = arith.truncf %20 : vector<16x512xf32> to vector<16x512xbf16>
    %c0_19 = arith.constant 0 : index
    %c0_20 = arith.constant 0 : index
    %22 = vector.load %arg5[%c0_19, %c0_20] : memref<512x256xbf16, #tpu.memory_space<vmem>>, vector<512x256xbf16>
    %cst_21 = arith.constant dense<0.000000e+00> : vector<16x256xf32>
    %23 = tpu.matmul %21, %22, %cst_21 {dimension_numbers = #tpu.dot_dimension_numbers<[1], [0], [0], [1], [0, 0, 1, 1], [], []>} : vector<16x512xbf16>, vector<512x256xbf16>, vector<16x256xf32> -> vector<16x256xf32>
    %c0_22 = arith.constant 0 : index
    %c0_23 = arith.constant 0 : index
    %24 = vector.load %arg6[%c0_22, %c0_23] : memref<1x256xf32, #tpu.memory_space<vmem>>, vector<1x256xf32>
    %25 = vector.broadcast %24 : vector<1x256xf32> to vector<16x256xf32>
    %26 = arith.addf %23, %25 : vector<16x256xf32>
    %cst_24 = arith.constant 5.000000e-01 : f32
    %27 = vector.broadcast %cst_24 : f32 to vector<16x256xf32>
    %28 = arith.mulf %27, %26 : vector<16x256xf32>
    %29 = math.tanh %28 : vector<16x256xf32>
    %cst_25 = arith.constant 5.000000e-01 : f32
    %30 = vector.broadcast %cst_25 : f32 to vector<16x256xf32>
    %31 = arith.mulf %30, %29 : vector<16x256xf32>
    %cst_26 = arith.constant 5.000000e-01 : f32
    %32 = vector.broadcast %cst_26 : f32 to vector<16x256xf32>
    %33 = arith.addf %31, %32 : vector<16x256xf32>
    %34 = vector.extract_strided_slice %33 {offsets = [0, 0], sizes = [2, 256], strides = [1, 1]} : vector<16x256xf32> to vector<2x256xf32>
    %c0_27 = arith.constant 0 : index
    %c0_28 = arith.constant 0 : index
    %35 = vector.load %arg7[%c0_27, %c0_28] : memref<2x256xf32, #tpu.memory_space<vmem>>, vector<2x256xf32>
    tpu.vector_store %arg7[%c0_27, %c0_28], %34 {strides = array<i32>} : memref<2x256xf32, #tpu.memory_space<vmem>>, vector<2x256xf32>,
    return
  }
}

</mosaic_0001>

<bundles_post_ra>
// kernel: tpu_custom_call.1
= control target key start
LH: loop header
LB: loop body
LE: loop exit
PB: predicated region body
PF: predicated region fallthrough
CT: control target
= control target key end

     0   :  { %12 = vsyncpa [#allocation4], 0  ;;  %s1916_s0 = inlined_call_operand.hbm [shape: f32[2,128], index: 0, kind: input, shape index: {}]   ;;  %s1917_s1 = inlined_call_operand.hbm [shape: bf16[128,256], index: 1, kind: input, shape index: {}]   ;;  %s1918_s2 = inlined_call_operand.vmem [shape: f32[1,256], index: 2, kind: input, shape index: {}]   ;;  %s1919_s3 = inlined_call_operand.hbm [shape: bf16[256,512], index: 3, kind: input, shape index: {}]   ;;  %s1920_s4 = inlined_call_operand.vmem [shape: f32[1,512], index: 4, kind: input, shape index: {}]   ;;  %s1921_s5 = inlined_call_operand.hbm [shape: bf16[512,256], index: 5, kind: input, shape index: {}]   ;;  %s1922_s6 = inlined_call_operand.vmem [shape: f32[1,256], index: 6, kind: input, shape index: {}]   ;;  %s1923_s7 = inlined_call_operand.hbm [shape: f32[2,256], index: 7, kind: output, shape index: {}]  }
   0x1   :  { %13 = vsyncpa [#allocation7], 0 }
   0x2   :  { %14 = vsyncpa [#allocation10], 0 }
   0x3   :  { %15 = vsyncpa [#allocation5], 0  ;;  %s1764_s24 = smov [#allocation6]   ;;  %s1646_s28 = scalar_lea.hbm %s1917_s1, 2048 }
   0x4   :  { %s31_s25 = sshll.u32 %s1764_s24, 4  ;;  %p1647_p0 = scmp.ne.s32.totalorder %s1917_s1, %s1646_s28  ;;  %s32_s25 = int_to_ptr.vmem [resolvable:$true] %s31_s25 }
   0x5   :  { %p1650_p1 = scmp.lt.u32.totalorder %s1646_s28, %s1917_s1 }
   0x7   :  { %p1652_p2 = pnand %p1650_p1, %p1647_p0 }
   0x9   :  { %1655 = shalt.err (!%p1652_p2)
}
   0xa   :  { %s1656_s10 = scalar_lea.vmem %s32_s25, 2048  ;;  %p1661_p4 = scmp.lt.s32.totalorder %s32_s25, %s32_s25 }
   0xb   :  { %p1657_p3 = scmp.ne.s32.totalorder %s32_s25, %s1656_s10  ;;  %p1662_p5 = scmp.lt.s32.totalorder %s1656_s10, %s1656_s10 }
   0xd   :  { %p1663_p6 = por %p1662_p5, %p1661_p4 }
   0xf   :  { %p1664_p7 = pnand %p1663_p6, %p1657_p3 }
  0x11   :  { %1667 = shalt.err (!%p1664_p7)
}
  0x12   :  { %s1765_s11 = smov 128   ;;  %s1766_s12 = smov 8  }
  0x13   :  { %37 = dma.hbm_to_vmem [thread:$0]  %s1917_s1, 2048, %s32_s25, [#allocation7], %s1765_s11, %s1765_s11, %s1766_s12  }
  0x14   :  { %s1767_s15 = smov [#allocation3]   ;;  %s1768_s17 = smov [#allocation8]  }
  0x15   :  { %s22_s16 = sshll.u32 %s1767_s15, 4  ;;  %s45_s18 = sshll.u32 %s1768_s17, 4  ;;  %s23_s16 = int_to_ptr.vmem [resolvable:$true] %s22_s16  ;;  %s46_s18 = int_to_ptr.vmem [resolvable:$true] %s45_s18 }
  0x16   :  { %s1668_s21 = scalar_lea.hbm %s1916_s0, 32 }
  0x17   :  { %p1669_p8 = scmp.ne.s32.totalorder %s1916_s0, %s1668_s21  ;;  %p1672_p9 = scmp.lt.u32.totalorder %s1668_s21, %s1916_s0 }
  0x19   :  { %p1674_p10 = pnand %p1672_p9, %p1669_p8 }
  0x1b   :  { %1677 = shalt.err (!%p1674_p10)
}
  0x1c   :  { %s1678_s1 = scalar_lea.vmem %s23_s16, 32  ;;  %p1683_p12 = scmp.lt.s32.totalorder %s23_s16, %s23_s16 }
  0x1d   :  { %p1679_p11 = scmp.ne.s32.totalorder %s23_s16, %s1678_s1  ;;  %p1684_p13 = scmp.lt.s32.totalorder %s1678_s1, %s1678_s1 }
  0x1f   :  { %p1685_p0 = por %p1684_p13, %p1683_p12 }
  0x21   :  { %p1686_p1 = pnand %p1685_p0, %p1679_p11 }
  0x23   :  { %1689 = shalt.err (!%p1686_p1)
}
  0x24   :  { %25 = dma.hbm_to_vmem [thread:$0]  %s1916_s0, 32, %s23_s16, [#allocation4]  }
  0x25   :  { %s1690_s30 = scalar_lea.hbm %s1919_s3, 8192 }
  0x26   :  { %p1691_p2 = scmp.ne.s32.totalorder %s1919_s3, %s1690_s30  ;;  %p1694_p3 = scmp.lt.u32.totalorder %s1690_s30, %s1919_s3 }
  0x28   :  { %p1696_p4 = pnand %p1694_p3, %p1691_p2 }
  0x2a   :  { %1699 = shalt.err (!%p1696_p4)
}
  0x2b   :  { %s1700_s14 = scalar_lea.vmem %s46_s18, 8192  ;;  %p1705_p6 = scmp.lt.s32.totalorder %s46_s18, %s46_s18 }
  0x2c   :  { %p1701_p5 = scmp.ne.s32.totalorder %s46_s18, %s1700_s14  ;;  %p1706_p7 = scmp.lt.s32.totalorder %s1700_s14, %s1700_s14 }
  0x2e   :  { %p1707_p8 = por %p1706_p7, %p1705_p6 }
  0x30   :  { %p1708_p9 = pnand %p1707_p8, %p1701_p5 }
  0x32   :  { %1711 = shalt.err (!%p1708_p9)
}
  0x33   :  { %s1769_s0 = smov 256   ;;  %s1770_s15 = smov 16  }
  0x34   :  { %51 = dma.hbm_to_vmem [thread:$0]  %s1919_s3, 8192, %s46_s18, [#allocation7], %s1769_s0, %s1769_s0, %s1770_s15  }
  0x35   :  { %s1771_s19 = smov [#allocation9]   ;;  %s1712_s23 = scalar_lea.hbm %s1921_s5, 8192 }
  0x36   :  { %s59_s20 = sshll.u32 %s1771_s19, 4  ;;  %p1713_p10 = scmp.ne.s32.totalorder %s1921_s5, %s1712_s23  ;;  %s60_s20 = int_to_ptr.vmem [resolvable:$true] %s59_s20 }
  0x37   :  { %p1716_p11 = scmp.lt.u32.totalorder %s1712_s23, %s1921_s5 }
  0x39   :  { %p1718_p12 = pnand %p1716_p11, %p1713_p10 }
  0x3b   :  { %1721 = shalt.err (!%p1718_p12)
}
  0x3c   :  { %s1722_s27 = scalar_lea.vmem %s60_s20, 8192  ;;  %p1727_p0 = scmp.lt.s32.totalorder %s60_s20, %s60_s20 }
  0x3d   :  { %p1723_p13 = scmp.ne.s32.totalorder %s60_s20, %s1722_s27  ;;  %p1728_p1 = scmp.lt.s32.totalorder %s1722_s27, %s1722_s27 }
  0x3f   :  { %p1729_p2 = por %p1728_p1, %p1727_p0 }
  0x41   :  { %p1730_p3 = pnand %p1729_p2, %p1723_p13 }
  0x43   :  { %1733 = shalt.err (!%p1730_p3)
}
  0x44   :  { %65 = dma.hbm_to_vmem [thread:$0]  %s1921_s5, 8192, %s60_s20, [#allocation10], %s1765_s11, %s1765_s11, %s1766_s12  }
  0x45   :  { %1756 = dma.done.wait [#allocation4], 32  }
  0x46   :  { %1757 = vsyncadd [#allocation4], 4294967264 }
  0x47   :  { %1758 = dma.done.wait [#allocation7], 10240  }
  0x48   :  { %1759 = vsyncadd [#allocation7], 4294957056 }
  0x49   :  { %1760 = dma.done.wait [#allocation10], 8192  }
  0x4a   :  { %1761 = vsyncadd [#allocation10], 4294959104  ;;  %v1772_v0 = vmov 0   ;;  %v1773_v1 = vmov 0.0   ;;  %v1426_v2 = vld [vmem:[#allocation6 + $0x4] ss:$8 sps:$4 sm:$0xff]  }
  0x4b   :  { %228 = vmatprep.mubr.bf16.mxu0 %v1772_v0  ;;  %81 = vst [vmem:[#allocation2] sm:$0xff] %v1773_v1  ;;  %v1428_v3 = vld [vmem:[#allocation6] ss:$8 sps:$4 sm:$0xff]   ;;  %196 = vmatprep.subr.bf16.mxu0 %v1426_v2  ;;  %v1429_v4 = vld [vmem:[#allocation6 + $0x14] ss:$8 sps:$4 sm:$0xff]  }
  0x4c   :  { %197 = vmatpush1.bf16.msra.mxu0 %v1428_v3  ;;  %v1431_v5 = vld [vmem:[#allocation6 + $0x10] ss:$8 sps:$4 sm:$0xff]   ;;  %v1432_v6 = vld [vmem:[#allocation6 + $0x24] ss:$8 sps:$4 sm:$0xff]   ;;  %v1434_v7 = vld [vmem:[#allocation6 + $0x20] ss:$8 sps:$4 sm:$0xff]  }
  0x4d   :  { %198 = vmatprep.subr.bf16.mxu0 %v1429_v4  ;;  %v1435_v8 = vld [vmem:[#allocation6 + $0x34] ss:$8 sps:$4 sm:$0xff]   ;;  %v1437_v10 = vld [vmem:[#allocation6 + $0x30] ss:$8 sps:$4 sm:$0xff]   ;;  %v1438_v11 = vld [vmem:[#allocation6 + $0x44] ss:$8 sps:$4 sm:$0xff]  }
  0x4e   :  { %v83_v9 = vld [vmem:[#allocation3] sm:$0x3]  ;;  %v1440_v12 = vld [vmem:[#allocation6 + $0x40] ss:$8 sps:$4 sm:$0xff]   ;;  %v1443_v14 = vld [vmem:[#allocation6 + $0x50] ss:$8 sps:$4 sm:$0xff]  }
  0x4f   :  { %84 = vst [vmem:[#allocation2] sm:$0x3] %v83_v9  ;;  %v1441_v13 = vld [vmem:[#allocation6 + $0x54] ss:$8 sps:$4 sm:$0xff]   ;;  %v1444_v15 = vld [vmem:[#allocation6 + $0x64] ss:$8 sps:$4 sm:$0xff]  }
  0x50   :  { %199 = vmatpush1.bf16.msra.mxu0 %v1431_v5  ;;  %v1446_v16 = vld [vmem:[#allocation6 + $0x60] ss:$8 sps:$4 sm:$0xff]   ;;  %v1447_v17 = vld [vmem:[#allocation6 + $0x74] ss:$8 sps:$4 sm:$0xff]   ;;  %v1449_v18 = vld [vmem:[#allocation6 + $0x70] ss:$8 sps:$4 sm:$0xff]  }
  0x51   :  { %200 = vmatprep.subr.bf16.mxu0 %v1432_v6  ;;  %v1452_v20 = vld [vmem:[#allocation8 + $0x4] ss:$16 sps:$4 sm:$0xff]   ;;  %v1450_v21 = vld [vmem:[#allocation8] ss:$16 sps:$4 sm:$0xff]   ;;  %v1500_v53 = vld [vmem:[#allocation8 + $0xc] ss:$16 sps:$4 sm:$0xff]  }
  0x52   :  { %v1455_v23 = vld [vmem:[#allocation8 + $0x24] ss:$16 sps:$4 sm:$0xff]   ;;  %v1453_v24 = vld [vmem:[#allocation8 + $0x20] ss:$16 sps:$4 sm:$0xff]  }
  0x53   :  { %v1458_v25 = vld [vmem:[#allocation8 + $0x44] ss:$16 sps:$4 sm:$0xff]   ;;  %v1456_v26 = vld [vmem:[#allocation8 + $0x40] ss:$16 sps:$4 sm:$0xff]  }
  0x54   :  { %201 = vmatpush1.bf16.msra.mxu0 %v1434_v7  ;;  %v1461_v27 = vld [vmem:[#allocation8 + $0x64] ss:$16 sps:$4 sm:$0xff]   ;;  %v1459_v28 = vld [vmem:[#allocation8 + $0x60] ss:$16 sps:$4 sm:$0xff]  }
  0x55   :  { %202 = vmatprep.subr.bf16.mxu0 %v1435_v8  ;;  %v1464_v29 = vld [vmem:[#allocation8 + $0x84] ss:$16 sps:$4 sm:$0xff]   ;;  %v1462_v30 = vld [vmem:[#allocation8 + $0x80] ss:$16 sps:$4 sm:$0xff]  }
  0x56   :  { %v85_v19 = vld [vmem:[#allocation2] sm:$0xff]  ;;  %v1548_v55 = vld [vmem:[#allocation9] ss:$8 sps:$4 sm:$0xff]  }
  0x57   :  { %v87_v22 = vpack.c.bf16 %v1773_v1, %v85_v19  ;;  %v1467_v31 = vld [vmem:[#allocation8 + $0xa4] ss:$16 sps:$4 sm:$0xff]   ;;  %v1465_v32 = vld [vmem:[#allocation8 + $0xa0] ss:$16 sps:$4 sm:$0xff]  }
  0x58   :  { %203 = vmatpush1.bf16.msra.mxu0 %v1437_v10  ;;  %v1470_v33 = vld [vmem:[#allocation8 + $0xc4] ss:$16 sps:$4 sm:$0xff]   ;;  %v1468_v34 = vld [vmem:[#allocation8 + $0xc0] ss:$16 sps:$4 sm:$0xff]  }
  0x59   :  { %204 = vmatprep.subr.bf16.mxu0 %v1438_v11  ;;  %v1473_v35 = vld [vmem:[#allocation8 + $0xe4] ss:$16 sps:$4 sm:$0xff]   ;;  %v1471_v36 = vld [vmem:[#allocation8 + $0xe0] ss:$16 sps:$4 sm:$0xff]   ;;  %v106_v11 = vlaneseq }
  0x5a   :  { %v1476_v37 = vld [vmem:[#allocation8 + $0x104] ss:$16 sps:$4 sm:$0xff]   ;;  %v1474_v38 = vld [vmem:[#allocation8 + $0x100] ss:$16 sps:$4 sm:$0xff]  }
  0x5b   :  { %v1479_v39 = vld [vmem:[#allocation8 + $0x124] ss:$16 sps:$4 sm:$0xff]   ;;  %v1477_v40 = vld [vmem:[#allocation8 + $0x120] ss:$16 sps:$4 sm:$0xff]  }
  0x5c   :  { %205 = vmatpush1.bf16.msra.mxu0 %v1440_v12  ;;  %v1482_v41 = vld [vmem:[#allocation8 + $0x144] ss:$16 sps:$4 sm:$0xff]   ;;  %v1480_v42 = vld [vmem:[#allocation8 + $0x140] ss:$16 sps:$4 sm:$0xff]  }
  0x5d   :  { %206 = vmatprep.subr.bf16.mxu0 %v1441_v13  ;;  %v1485_v43 = vld [vmem:[#allocation8 + $0x164] ss:$16 sps:$4 sm:$0xff]   ;;  %v1483_v44 = vld [vmem:[#allocation8 + $0x160] ss:$16 sps:$4 sm:$0xff]  }
  0x5e   :  { %v1488_v45 = vld [vmem:[#allocation8 + $0x184] ss:$16 sps:$4 sm:$0xff]   ;;  %v1486_v46 = vld [vmem:[#allocation8 + $0x180] ss:$16 sps:$4 sm:$0xff]  }
  0x5f   :  { %v1491_v47 = vld [vmem:[#allocation8 + $0x1a4] ss:$16 sps:$4 sm:$0xff]   ;;  %v1489_v48 = vld [vmem:[#allocation8 + $0x1a0] ss:$16 sps:$4 sm:$0xff]  }
  0x60   :  { %207 = vmatpush1.bf16.msra.mxu0 %v1443_v14  ;;  %v1494_v49 = vld [vmem:[#allocation8 + $0x1c4] ss:$16 sps:$4 sm:$0xff]   ;;  %v1492_v50 = vld [vmem:[#allocation8 + $0x1c0] ss:$16 sps:$4 sm:$0xff]   ;;  %v1869_v14 = vshrl.u32 %v106_v11, 7 }
  0x61   :  { %208 = vmatprep.subr.bf16.mxu0 %v1444_v15  ;;  %v1497_v51 = vld [vmem:[#allocation8 + $0x1e4] ss:$16 sps:$4 sm:$0xff]   ;;  %v1495_v52 = vld [vmem:[#allocation8 + $0x1e0] ss:$16 sps:$4 sm:$0xff]  }
  0x62   :  { %v1546_v54 = vld [vmem:[#allocation9 + $0x4] ss:$8 sps:$4 sm:$0xff]   ;;  %v1549_v56 = vld [vmem:[#allocation9 + $0x14] ss:$8 sps:$4 sm:$0xff]   ;;  %v1551_v57 = vld [vmem:[#allocation9 + $0x10] ss:$8 sps:$4 sm:$0xff]  }
  0x63   :  { %1145 = vmatprep.subr.bf16.mxu1 %v1546_v54  ;;  %v1552_v58 = vld [vmem:[#allocation9 + $0x24] ss:$8 sps:$4 sm:$0xff]   ;;  %v1554_v59 = vld [vmem:[#allocation9 + $0x20] ss:$8 sps:$4 sm:$0xff]   ;;  %v1555_v60 = vld [vmem:[#allocation9 + $0x34] ss:$8 sps:$4 sm:$0xff]  }
  0x64   :  { %209 = vmatpush1.bf16.msra.mxu0 %v1446_v16  ;;  %1146 = vmatpush1.bf16.msra.mxu1 %v1548_v55  ;;  %v1557_v61 = vld [vmem:[#allocation9 + $0x30] ss:$8 sps:$4 sm:$0xff]   ;;  %v1558_v62 = vld [vmem:[#allocation9 + $0x44] ss:$8 sps:$4 sm:$0xff]   ;;  %v1560_v63 = vld [vmem:[#allocation9 + $0x40] ss:$8 sps:$4 sm:$0xff]  }
  0x65   :  { %210 = vmatprep.subr.bf16.mxu0 %v1447_v17  ;;  %1147 = vmatprep.subr.bf16.mxu1 %v1549_v56  ;;  %v1561_v0 = vld [vmem:[#allocation9 + $0x54] ss:$8 sps:$4 sm:$0xff]   ;;  %v1563_v1 = vld [vmem:[#allocation9 + $0x50] ss:$8 sps:$4 sm:$0xff]   ;;  %v1564_v2 = vld [vmem:[#allocation9 + $0x64] ss:$8 sps:$4 sm:$0xff]  }
  0x66   :  { %v1566_v3 = vld [vmem:[#allocation9 + $0x60] ss:$8 sps:$4 sm:$0xff]   ;;  %v1567_v4 = vld [vmem:[#allocation9 + $0x74] ss:$8 sps:$4 sm:$0xff]   ;;  %v1569_v5 = vld [vmem:[#allocation9 + $0x70] ss:$8 sps:$4 sm:$0xff]  }
  0x67   :  { %v1570_v6 = vld [vmem:[#allocation9 + $0x84] ss:$8 sps:$4 sm:$0xff]   ;;  %v1572_v7 = vld [vmem:[#allocation9 + $0x80] ss:$8 sps:$4 sm:$0xff]   ;;  %v1573_v8 = vld [vmem:[#allocation9 + $0x94] ss:$8 sps:$4 sm:$0xff]  }
  0x68   :  { %211 = vmatpush1.bf16.msra.mxu0 %v1449_v18  ;;  %1148 = vmatpush1.bf16.msra.mxu1 %v1551_v57  ;;  %v1575_v9 = vld [vmem:[#allocation9 + $0x90] ss:$8 sps:$4 sm:$0xff]   ;;  %v1576_v10 = vld [vmem:[#allocation9 + $0xa4] ss:$8 sps:$4 sm:$0xff]   ;;  %v1578_v12 = vld [vmem:[#allocation9 + $0xa0] ss:$8 sps:$4 sm:$0xff]  }
  0x69   :  { %651 = vmatprep.subr.bf16.mxu0 %v1452_v20  ;;  %1149 = vmatprep.subr.bf16.mxu1 %v1552_v58  ;;  %v1579_v13 = vld [vmem:[#allocation9 + $0xb4] ss:$8 sps:$4 sm:$0xff]   ;;  %v1581_v15 = vld [vmem:[#allocation9 + $0xb0] ss:$8 sps:$4 sm:$0xff]   ;;  %v1582_v16 = vld [vmem:[#allocation9 + $0xc4] ss:$8 sps:$4 sm:$0xff]  }
  0x6a   :  { %v1872_v17 = vsub.s32 0, %v1869_v14  ;;  %v104_v18 = vld [vmem:[%s1918_s2] sm:$0x3]  ;;  %v1878_v19 = vsub.s32 1, %v1869_v14  ;;  %v1584_v20 = vld [vmem:[#allocation9 + $0xc0] ss:$8 sps:$4 sm:$0xff]  }
  0x6b   :  { %229 = vmatmul.mubr.bf16.vlgmr.msra.gmra.mrb[0].mxu0 %v87_v22  ;;  %v1524_v54 = vld [vmem:[#allocation8 + $0x10c] ss:$16 sps:$4 sm:$0xff]   ;;  %v1522_v55 = vld [vmem:[#allocation8 + $0x108] ss:$16 sps:$4 sm:$0xff]  }
  0x6c   :  { %652 = vmatpush1.bf16.msra.mxu0 %v1450_v21  ;;  %1150 = vmatpush1.bf16.msra.mxu1 %v1554_v59  ;;  %v1585_v21 = vld [vmem:[#allocation9 + $0xd4] ss:$8 sps:$4 sm:$0xff]   ;;  %v109_v22 = vrot.slane %v104_v18, %v1872_v17  ;;  %v1525_v57 = vld [vmem:[#allocation8 + $0x128] ss:$16 sps:$4 sm:$0xff]  }
  0x6d   :  { %653 = vmatprep.subr.bf16.mxu0 %v1455_v23  ;;  %1151 = vmatprep.subr.bf16.mxu1 %v1555_v60  ;;  %v113_v23 = vrot.slane %v104_v18, %v1878_v19  ;;  %v1527_v56 = vld [vmem:[#allocation8 + $0x12c] ss:$16 sps:$4 sm:$0xff]   ;;  %v1528_v59 = vld [vmem:[#allocation8 + $0x148] ss:$16 sps:$4 sm:$0xff]  }
  0x6e   :  { %v1530_v58 = vld [vmem:[#allocation8 + $0x14c] ss:$16 sps:$4 sm:$0xff]   ;;  %v1889_v11 = vld [vmem:[%s1920_s4] sm:$0xf] }
  0x6f   :  { %v1533_v60 = vld [vmem:[#allocation8 + $0x16c] ss:$16 sps:$4 sm:$0xff]  }
  0x70   :  { %654 = vmatpush1.bf16.msra.mxu0 %v1453_v24  ;;  %1152 = vmatpush1.bf16.msra.mxu1 %v1557_v61  ;;  %v1587_v24 = vld [vmem:[#allocation9 + $0xd0] ss:$8 sps:$4 sm:$0xff]  }
  0x71   :  { %655 = vmatprep.subr.bf16.mxu0 %v1458_v25  ;;  %1153 = vmatprep.subr.bf16.mxu1 %v1558_v62  ;;  %v1531_v61 = vld [vmem:[#allocation8 + $0x168] ss:$16 sps:$4 sm:$0xff]   ;;  %v1536_v62 = vld [vmem:[#allocation8 + $0x18c] ss:$16 sps:$4 sm:$0xff]  }
  0x74   :  { %656 = vmatpush1.bf16.msra.mxu0 %v1456_v26  ;;  %1154 = vmatpush1.bf16.msra.mxu1 %v1560_v63  ;;  %v1534_v63 = vld [vmem:[#allocation8 + $0x188] ss:$16 sps:$4 sm:$0xff]  }
  0x75   :  { %657 = vmatprep.subr.bf16.mxu0 %v1461_v27  ;;  %1155 = vmatprep.subr.bf16.mxu1 %v1561_v0  ;;  %v1539_v0 = vld [vmem:[#allocation8 + $0x1ac] ss:$16 sps:$4 sm:$0xff]  }
  0x78   :  { %658 = vmatpush1.bf16.msra.mxu0 %v1459_v28  ;;  %1156 = vmatpush1.bf16.msra.mxu1 %v1563_v1  ;;  %v1537_v1 = vld [vmem:[#allocation8 + $0x1a8] ss:$16 sps:$4 sm:$0xff]  }
  0x79   :  { %659 = vmatprep.subr.bf16.mxu0 %v1464_v29  ;;  %1157 = vmatprep.subr.bf16.mxu1 %v1564_v2  ;;  %v1542_v2 = vld [vmem:[#allocation8 + $0x1cc] ss:$16 sps:$4 sm:$0xff]  }
  0x7c   :  { %660 = vmatpush1.bf16.msra.mxu0 %v1462_v30  ;;  %1158 = vmatpush1.bf16.msra.mxu1 %v1566_v3  ;;  %v1540_v3 = vld [vmem:[#allocation8 + $0x1c8] ss:$16 sps:$4 sm:$0xff]  }
  0x7d   :  { %661 = vmatprep.subr.bf16.mxu0 %v1467_v31  ;;  %1159 = vmatprep.subr.bf16.mxu1 %v1567_v4  ;;  %v1545_v4 = vld [vmem:[#allocation8 + $0x1ec] ss:$16 sps:$4 sm:$0xff]  }
  0x80   :  { %662 = vmatpush1.bf16.msra.mxu0 %v1465_v32  ;;  %1160 = vmatpush1.bf16.msra.mxu1 %v1569_v5  ;;  %v1543_v5 = vld [vmem:[#allocation8 + $0x1e8] ss:$16 sps:$4 sm:$0xff]  }
  0x81   :  { %663 = vmatprep.subr.bf16.mxu0 %v1470_v33  ;;  %1161 = vmatprep.subr.bf16.mxu1 %v1570_v6  ;;  %v1588_v6 = vld [vmem:[#allocation9 + $0xe4] ss:$8 sps:$4 sm:$0xff]  }
  0x84   :  { %664 = vmatpush1.bf16.msra.mxu0 %v1468_v34  ;;  %1162 = vmatpush1.bf16.msra.mxu1 %v1572_v7  ;;  %v1590_v7 = vld [vmem:[#allocation9 + $0xe0] ss:$8 sps:$4 sm:$0xff]  }
  0x85   :  { %665 = vmatprep.subr.bf16.mxu0 %v1473_v35  ;;  %1163 = vmatprep.subr.bf16.mxu1 %v1573_v8  ;;  %v1591_v8 = vld [vmem:[#allocation9 + $0xf4] ss:$8 sps:$4 sm:$0xff]  }
  0x88   :  { %666 = vmatpush1.bf16.msra.mxu0 %v1471_v36  ;;  %1164 = vmatpush1.bf16.msra.mxu1 %v1575_v9  ;;  %v1593_v9 = vld [vmem:[#allocation9 + $0xf0] ss:$8 sps:$4 sm:$0xff]  }
  0x89   :  { %667 = vmatprep.subr.bf16.mxu0 %v1476_v37  ;;  %1165 = vmatprep.subr.bf16.mxu1 %v1576_v10  ;;  %v1596_v10 = vld [vmem:[#allocation9 + $0x104] ss:$8 sps:$4 sm:$0xff]  }
  0x8c   :  { %668 = vmatpush1.bf16.msra.mxu0 %v1474_v38  ;;  %1166 = vmatpush1.bf16.msra.mxu1 %v1578_v12  ;;  %v314_v12 = vrot.slane %v1889_v11, %v1872_v17 }
  0x8d   :  { %669 = vmatprep.subr.bf16.mxu0 %v1479_v39  ;;  %1167 = vmatprep.subr.bf16.mxu1 %v1579_v13  ;;  %v1498_v39 = vld [vmem:[#allocation8 + $0x8] ss:$16 sps:$4 sm:$0xff]   ;;  %v318_v13 = vrot.slane %v1889_v11, %v1878_v19 }
  0x90   :  { %670 = vmatpush1.bf16.msra.mxu0 %v1477_v40  ;;  %1168 = vmatpush1.bf16.msra.mxu1 %v1581_v15  ;;  %v1503_v40 = vld [vmem:[#allocation8 + $0x2c] ss:$16 sps:$4 sm:$0xff]  }
  0x91   :  { %671 = vmatprep.subr.bf16.mxu0 %v1482_v41  ;;  %1169 = vmatprep.subr.bf16.mxu1 %v1582_v16  ;;  %v1501_v41 = vld [vmem:[#allocation8 + $0x28] ss:$16 sps:$4 sm:$0xff]  }
  0x94   :  { %672 = vmatpush1.bf16.msra.mxu0 %v1480_v42  ;;  %1170 = vmatpush1.bf16.msra.mxu1 %v1584_v20  ;;  %v1506_v42 = vld [vmem:[#allocation8 + $0x4c] ss:$16 sps:$4 sm:$0xff]  }
  0x95   :  { %673 = vmatprep.subr.bf16.mxu0 %v1485_v43  ;;  %1171 = vmatprep.subr.bf16.mxu1 %v1585_v21  ;;  %v1504_v43 = vld [vmem:[#allocation8 + $0x48] ss:$16 sps:$4 sm:$0xff]  }
  0x98   :  { %674 = vmatpush1.bf16.msra.mxu0 %v1483_v44  ;;  %1172 = vmatpush1.bf16.msra.mxu1 %v1587_v24  ;;  %v1509_v44 = vld [vmem:[#allocation8 + $0x6c] ss:$16 sps:$4 sm:$0xff]  }
  0x99   :  { %675 = vmatprep.subr.bf16.mxu0 %v1488_v45  ;;  %v1507_v45 = vld [vmem:[#allocation8 + $0x68] ss:$16 sps:$4 sm:$0xff]   ;;  %1173 = vmatprep.subr.bf16.mxu1 %v1588_v6 }
  0x9c   :  { %676 = vmatpush1.bf16.msra.mxu0 %v1486_v46  ;;  %v1512_v46 = vld [vmem:[#allocation8 + $0x8c] ss:$16 sps:$4 sm:$0xff]   ;;  %1174 = vmatpush1.bf16.msra.mxu1 %v1590_v7 }
  0x9d   :  { %677 = vmatprep.subr.bf16.mxu0 %v1491_v47  ;;  %v1510_v47 = vld [vmem:[#allocation8 + $0x88] ss:$16 sps:$4 sm:$0xff]   ;;  %1175 = vmatprep.subr.bf16.mxu1 %v1591_v8 }
  0x9e   :  { %v1639_v8 = vld [vmem:[#allocation9 + $0x1f0] ss:$8 sps:$4 sm:$0xff]  }
  0xa0   :  { %678 = vmatpush1.bf16.msra.mxu0 %v1489_v48  ;;  %v1515_v48 = vld [vmem:[#allocation8 + $0xac] ss:$16 sps:$4 sm:$0xff]   ;;  %1176 = vmatpush1.bf16.msra.mxu1 %v1593_v9 }
  0xa1   :  { %679 = vmatprep.subr.bf16.mxu0 %v1494_v49  ;;  %v1513_v49 = vld [vmem:[#allocation8 + $0xa8] ss:$16 sps:$4 sm:$0xff]   ;;  %1186 = vmatprep.subr.bf16.mxu1 %v1596_v10 }
  0xa4   :  { %680 = vmatpush1.bf16.msra.mxu0 %v1492_v50  ;;  %v1518_v50 = vld [vmem:[#allocation8 + $0xcc] ss:$16 sps:$4 sm:$0xff]  }
  0xa5   :  { %681 = vmatprep.subr.bf16.mxu0 %v1497_v51  ;;  %v1516_v51 = vld [vmem:[#allocation8 + $0xc8] ss:$16 sps:$4 sm:$0xff]  }
  0xa8   :  { %682 = vmatpush1.bf16.msra.mxu0 %v1495_v52  ;;  %v1521_v52 = vld [vmem:[#allocation8 + $0xec] ss:$16 sps:$4 sm:$0xff]  }
  0xa9   :  { %694 = vmatprep.subr.bf16.mxu0 %v1500_v53  ;;  %v1519_v53 = vld [vmem:[#allocation8 + $0xe8] ss:$16 sps:$4 sm:$0xff]  }
 0x13e   :  { %v230_v25 = vpop.f32.mrb[0].mxu0 }
 0x13f   :  { %v231_v26 = vadd.f32 %v230_v25, %v109_v22  ;;  %v232_v27 = vpop.f32.mrb[1].mxu0 }
 0x140   :  { %v233_v28 = vadd.f32 %v232_v27, %v113_v23  ;;  %v234_v29 = vpop.f32.mrb[2].mxu0 }
 0x141   :  { %v235_v30 = vadd.f32 %v234_v29, %v109_v22  ;;  %v236_v31 = vpop.f32.mrb[3].mxu0  ;;  %v239_v33 = vmax.f32 %v231_v26, 0.0 }
 0x142   :  { %v237_v32 = vadd.f32 %v236_v31, %v113_v23  ;;  %v240_v35 = vmax.f32 %v233_v28, 0.0  ;;  %v1594_v31 = vld [vmem:[#allocation9 + $0x100] ss:$8 sps:$4 sm:$0xff]  }
 0x143   :  { %v241_v34 = vmax.f32 %v235_v30, 0.0 }
 0x144   :  { %v242_v36 = vmax.f32 %v237_v32, 0.0  ;;  %v1599_v32 = vld [vmem:[#allocation9 + $0x114] ss:$8 sps:$4 sm:$0xff]  }
 0x145   :  { %v1882_v37 = vpack.c.bf16 %v241_v34, %v239_v33  ;;  %v1597_v33 = vld [vmem:[#allocation9 + $0x110] ss:$8 sps:$4 sm:$0xff]   ;;  %v1602_v34 = vld [vmem:[#allocation9 + $0x124] ss:$8 sps:$4 sm:$0xff]  }
 0x146   :  { %v244_v38 = vpack.c.bf16 %v242_v36, %v240_v35  ;;  %v1600_v35 = vld [vmem:[#allocation9 + $0x120] ss:$8 sps:$4 sm:$0xff]   ;;  %v1605_v36 = vld [vmem:[#allocation9 + $0x134] ss:$8 sps:$4 sm:$0xff]  }
 0x148   :  { %683 = vmatprep.mubr.bf16.mxu0 %v244_v38 }
 0x149   :  { %684 = vmatmul.mubr.bf16.vlgmr.msra.gmra.mrb[4].mxu0 %v1882_v37 }
 0x14a   :  { %695 = vmatpush1.bf16.msra.mxu0 %v1498_v39  ;;  %726 = vmatprep.mubr.bf16.mxu0 %v244_v38  ;;  %v1608_v38 = vld [vmem:[#allocation9 + $0x144] ss:$8 sps:$4 sm:$0xff]   ;;  %v1606_v39 = vld [vmem:[#allocation9 + $0x140] ss:$8 sps:$4 sm:$0xff]  }
 0x14b   :  { %696 = vmatprep.subr.bf16.mxu0 %v1503_v40  ;;  %v1611_v40 = vld [vmem:[#allocation9 + $0x154] ss:$8 sps:$4 sm:$0xff]  }
 0x14e   :  { %697 = vmatpush1.bf16.msra.mxu0 %v1501_v41  ;;  %v1609_v41 = vld [vmem:[#allocation9 + $0x150] ss:$8 sps:$4 sm:$0xff]  }
 0x14f   :  { %698 = vmatprep.subr.bf16.mxu0 %v1506_v42  ;;  %v1614_v42 = vld [vmem:[#allocation9 + $0x164] ss:$8 sps:$4 sm:$0xff]  }
 0x152   :  { %699 = vmatpush1.bf16.msra.mxu0 %v1504_v43  ;;  %v1612_v43 = vld [vmem:[#allocation9 + $0x160] ss:$8 sps:$4 sm:$0xff]  }
 0x153   :  { %700 = vmatprep.subr.bf16.mxu0 %v1509_v44  ;;  %v1617_v44 = vld [vmem:[#allocation9 + $0x174] ss:$8 sps:$4 sm:$0xff]  }
 0x156   :  { %701 = vmatpush1.bf16.msra.mxu0 %v1507_v45  ;;  %v1615_v45 = vld [vmem:[#allocation9 + $0x170] ss:$8 sps:$4 sm:$0xff]  }
 0x157   :  { %702 = vmatprep.subr.bf16.mxu0 %v1512_v46  ;;  %v1620_v46 = vld [vmem:[#allocation9 + $0x184] ss:$8 sps:$4 sm:$0xff]  }
 0x15a   :  { %703 = vmatpush1.bf16.msra.mxu0 %v1510_v47  ;;  %v1618_v47 = vld [vmem:[#allocation9 + $0x180] ss:$8 sps:$4 sm:$0xff]  }
 0x15b   :  { %704 = vmatprep.subr.bf16.mxu0 %v1515_v48  ;;  %v1623_v48 = vld [vmem:[#allocation9 + $0x194] ss:$8 sps:$4 sm:$0xff]  }
 0x15e   :  { %705 = vmatpush1.bf16.msra.mxu0 %v1513_v49  ;;  %v1621_v49 = vld [vmem:[#allocation9 + $0x190] ss:$8 sps:$4 sm:$0xff]  }
 0x15f   :  { %706 = vmatprep.subr.bf16.mxu0 %v1518_v50  ;;  %v1626_v50 = vld [vmem:[#allocation9 + $0x1a4] ss:$8 sps:$4 sm:$0xff]  }
 0x162   :  { %707 = vmatpush1.bf16.msra.mxu0 %v1516_v51  ;;  %v1624_v51 = vld [vmem:[#allocation9 + $0x1a0] ss:$8 sps:$4 sm:$0xff]  }
 0x163   :  { %708 = vmatprep.subr.bf16.mxu0 %v1521_v52  ;;  %v1629_v52 = vld [vmem:[#allocation9 + $0x1b4] ss:$8 sps:$4 sm:$0xff]  }
 0x166   :  { %709 = vmatpush1.bf16.msra.mxu0 %v1519_v53  ;;  %v1627_v53 = vld [vmem:[#allocation9 + $0x1b0] ss:$8 sps:$4 sm:$0xff]  }
 0x167   :  { %710 = vmatprep.subr.bf16.mxu0 %v1524_v54  ;;  %v1632_v54 = vld [vmem:[#allocation9 + $0x1c4] ss:$8 sps:$4 sm:$0xff]  }
 0x16a   :  { %711 = vmatpush1.bf16.msra.mxu0 %v1522_v55  ;;  %v1630_v55 = vld [vmem:[#allocation9 + $0x1c0] ss:$8 sps:$4 sm:$0xff]  }
 0x16b   :  { %712 = vmatprep.subr.bf16.mxu0 %v1527_v56  ;;  %v1635_v56 = vld [vmem:[#allocation9 + $0x1d4] ss:$8 sps:$4 sm:$0xff]  }
 0x16e   :  { %713 = vmatpush1.bf16.msra.mxu0 %v1525_v57  ;;  %v321_v57 = vsub.s32 2, %v1869_v14 }
 0x16f   :  { %714 = vmatprep.subr.bf16.mxu0 %v1530_v58  ;;  %v325_v58 = vsub.s32 3, %v1869_v14 }
 0x172   :  { %715 = vmatpush1.bf16.msra.mxu0 %v1528_v59  ;;  %v1633_v59 = vld [vmem:[#allocation9 + $0x1d0] ss:$8 sps:$4 sm:$0xff]  }
 0x173   :  { %716 = vmatprep.subr.bf16.mxu0 %v1533_v60  ;;  %v322_v60 = vrot.slane %v1889_v11, %v321_v57 }
 0x176   :  { %717 = vmatpush1.bf16.msra.mxu0 %v1531_v61  ;;  %v1638_v61 = vld [vmem:[#allocation9 + $0x1e4] ss:$8 sps:$4 sm:$0xff]  }
 0x177   :  { %718 = vmatprep.subr.bf16.mxu0 %v1536_v62  ;;  %v326_v62 = vrot.slane %v1889_v11, %v325_v58 }
 0x17a   :  { %719 = vmatpush1.bf16.msra.mxu0 %v1534_v63 }
 0x17b   :  { %720 = vmatprep.subr.bf16.mxu0 %v1539_v0  ;;  %v1636_v0 = vld [vmem:[#allocation9 + $0x1e0] ss:$8 sps:$4 sm:$0xff]  }
 0x17e   :  { %721 = vmatpush1.bf16.msra.mxu0 %v1537_v1 }
 0x17f   :  { %722 = vmatprep.subr.bf16.mxu0 %v1542_v2 }
 0x182   :  { %723 = vmatpush1.bf16.msra.mxu0 %v1540_v3  ;;  %v1641_v3 = vld [vmem:[#allocation9 + $0x1f4] ss:$8 sps:$4 sm:$0xff]  }
 0x183   :  { %724 = vmatprep.subr.bf16.mxu0 %v1545_v4 }
 0x186   :  { %725 = vmatpush1.bf16.msra.mxu0 %v1543_v5 }
 0x189   :  { %727 = vmatmul.mubr.bf16.vlgmr.msra.gmra.mrb[8].mxu0 %v1882_v37  ;;  %v1603_v37 = vld [vmem:[#allocation9 + $0x130] ss:$8 sps:$4 sm:$0xff]  }
 0x21c   :  { %v685_v15 = vpop.f32.mrb[4].mxu0 }
 0x21d   :  { %v686_v16 = vadd.f32 %v685_v15, %v314_v12  ;;  %v687_v18 = vpop.f32.mrb[5].mxu0 }
 0x21e   :  { %v688_v20 = vadd.f32 %v687_v18, %v318_v13  ;;  %v689_v21 = vpop.f32.mrb[6].mxu0 }
 0x21f   :  { %v690_v22 = vadd.f32 %v689_v21, %v314_v12  ;;  %v691_v23 = vpop.f32.mrb[7].mxu0  ;;  %v737_v25 = vmax.f32 %v686_v16, 0.0  ;;  %v813_v16 = vld [vmem:[%s1922_s6] sm:$0x3]  ;;  %s1774_s6 = smov [#allocation11]  }
 0x220   :  { %v692_v24 = vadd.f32 %v691_v23, %v318_v13  ;;  %v738_v27 = vmax.f32 %v688_v20, 0.0  ;;  %v818_v18 = vrot.slane %v813_v16, %v1872_v17  ;;  %v822_v20 = vrot.slane %v813_v16, %v1878_v19  ;;  %s1253_s29 = sshll.u32 %s1774_s6, 4  ;;  %s1254_s29 = int_to_ptr.vmem [resolvable:$true] %s1253_s29 }
 0x221   :  { %v741_v26 = vmax.f32 %v690_v22, 0.0  ;;  %s1734_s30 = scalar_lea.vmem %s1254_s29, 64  ;;  %p1739_p5 = scmp.lt.s32.totalorder %s1254_s29, %s1254_s29 }
 0x222   :  { %v742_v28 = vmax.f32 %v692_v24, 0.0  ;;  %p1735_p4 = scmp.ne.s32.totalorder %s1254_s29, %s1734_s30  ;;  %p1740_p6 = scmp.lt.s32.totalorder %s1734_s30, %s1734_s30 }
 0x223   :  { %v745_v29 = vpack.c.bf16 %v741_v26, %v737_v25 }
 0x224   :  { %v746_v30 = vpack.c.bf16 %v742_v28, %v738_v27  ;;  %p1741_p7 = por %p1740_p6, %p1739_p5 }
 0x226   :  { %1177 = vmatprep.mubr.bf16.mxu1 %v746_v30  ;;  %p1742_p8 = pnand %p1741_p7, %p1735_p4 }
 0x227   :  { %1178 = vmatmul.mubr.bf16.vlgmr.msra.gmra.mrb[0].mxu1 %v745_v29 }
 0x228   :  { %1187 = vmatpush1.bf16.msra.mxu1 %v1594_v31 }
 0x229   :  { %1188 = vmatprep.subr.bf16.mxu1 %v1599_v32 }
 0x22c   :  { %1189 = vmatpush1.bf16.msra.mxu1 %v1597_v33 }
 0x22d   :  { %1190 = vmatprep.subr.bf16.mxu1 %v1602_v34 }
 0x230   :  { %1191 = vmatpush1.bf16.msra.mxu1 %v1600_v35 }
 0x231   :  { %1192 = vmatprep.subr.bf16.mxu1 %v1605_v36 }
 0x234   :  { %1193 = vmatpush1.bf16.msra.mxu1 %v1603_v37 }
 0x235   :  { %1194 = vmatprep.subr.bf16.mxu1 %v1608_v38 }
 0x238   :  { %1195 = vmatpush1.bf16.msra.mxu1 %v1606_v39 }
 0x239   :  { %1196 = vmatprep.subr.bf16.mxu1 %v1611_v40 }
 0x23c   :  { %1197 = vmatpush1.bf16.msra.mxu1 %v1609_v41 }
 0x23d   :  { %1198 = vmatprep.subr.bf16.mxu1 %v1614_v42 }
 0x240   :  { %1199 = vmatpush1.bf16.msra.mxu1 %v1612_v43 }
 0x241   :  { %1200 = vmatprep.subr.bf16.mxu1 %v1617_v44 }
 0x244   :  { %1201 = vmatpush1.bf16.msra.mxu1 %v1615_v45 }
 0x245   :  { %1202 = vmatprep.subr.bf16.mxu1 %v1620_v46 }
 0x248   :  { %1203 = vmatpush1.bf16.msra.mxu1 %v1618_v47 }
 0x249   :  { %1204 = vmatprep.subr.bf16.mxu1 %v1623_v48 }
 0x24c   :  { %1205 = vmatpush1.bf16.msra.mxu1 %v1621_v49 }
 0x24d   :  { %1206 = vmatprep.subr.bf16.mxu1 %v1626_v50 }
 0x250   :  { %1207 = vmatpush1.bf16.msra.mxu1 %v1624_v51 }
 0x251   :  { %1208 = vmatprep.subr.bf16.mxu1 %v1629_v52 }
 0x254   :  { %1209 = vmatpush1.bf16.msra.mxu1 %v1627_v53 }
 0x255   :  { %1210 = vmatprep.subr.bf16.mxu1 %v1632_v54 }
 0x258   :  { %1211 = vmatpush1.bf16.msra.mxu1 %v1630_v55 }
 0x259   :  { %1212 = vmatprep.subr.bf16.mxu1 %v1635_v56 }
 0x25c   :  { %v728_v63 = vpop.f32.mrb[8].mxu0  ;;  %1213 = vmatpush1.bf16.msra.mxu1 %v1633_v59 }
 0x25d   :  { %v729_v1 = vadd.f32 %v728_v63, %v322_v60  ;;  %v730_v2 = vpop.f32.mrb[9].mxu0  ;;  %1214 = vmatprep.subr.bf16.mxu1 %v1638_v61 }
 0x25e   :  { %v731_v4 = vadd.f32 %v730_v2, %v326_v62  ;;  %v732_v5 = vpop.f32.mrb[10].mxu0 }
 0x25f   :  { %v733_v6 = vadd.f32 %v732_v5, %v322_v60  ;;  %v734_v7 = vpop.f32.mrb[11].mxu0  ;;  %v739_v9 = vmax.f32 %v729_v1, 0.0 }
 0x260   :  { %v735_v14 = vadd.f32 %v734_v7, %v326_v62  ;;  %1215 = vmatpush1.bf16.msra.mxu1 %v1636_v0  ;;  %v740_v12 = vmax.f32 %v731_v4, 0.0 }
 0x261   :  { %v743_v10 = vmax.f32 %v733_v6, 0.0  ;;  %1216 = vmatprep.subr.bf16.mxu1 %v1641_v3 }
 0x262   :  { %v744_v13 = vmax.f32 %v735_v14, 0.0 }
 0x263   :  { %v747_v11 = vpack.c.bf16 %v743_v10, %v739_v9 }
 0x264   :  { %v748_v15 = vpack.c.bf16 %v744_v13, %v740_v12  ;;  %1217 = vmatpush1.bf16.msra.mxu1 %v1639_v8 }
 0x266   :  { %1218 = vmatprep.mubr.bf16.mxu1 %v748_v15 }
 0x267   :  { %1219 = vmatmul.mubr.bf16.vlgmr.msra.gmra.mrb[0].mxu1 %v747_v11 }
 0x33a   :  { %v1220_v21 = vpop.f32.mrb[0].mxu1 }
 0x33b   :  { %v1409_v22 = vadd.f32 %v1220_v21, %v818_v18  ;;  %v1222_v23 = vpop.f32.mrb[1].mxu1 }
 0x33c   :  { %v1410_v24 = vadd.f32 %v1222_v23, %v822_v20  ;;  %v1224_v25 = vpop.f32.mrb[2].mxu1 }
 0x33d   :  { %v1227_v26 = vmul.f32 0.5, %v1409_v22  ;;  %v1225_v27 = vpop.f32.mrb[3].mxu1 }
 0x33e   :  { %v1228_v28 = vmul.f32 0.5, %v1410_v24 }
 0x33f   :  { %1642 = vtanh.f32 %v1227_v26 }
 0x340   :  { %1644 = vtanh.f32 %v1228_v28 }
 0x349   :  { %v1643_v29 = vpop.eup %1642 }
 0x34a   :  { %v1645_v30 = vpop.eup %1644  ;;  %v1231_v31 = vmul.f32 0.5, %v1643_v29 }
 0x34b   :  { %v1232_v32 = vmul.f32 0.5, %v1645_v30 }
 0x34c   :  { %v1233_v33 = vadd.f32 0.5, %v1231_v31 }
 0x34d   :  { %v1234_v17 = vadd.f32 0.5, %v1232_v32 }
 0x34f   :  { %v1237_v34 = vcombine.low %v1233_v33, %v1234_v17 }
 0x351   :  { %1408 = vst.sshfl [vmem:[#allocation11] sm:$0x33 pattern:$0x76325410] %v1237_v34 }
 0x352   :  { %1745 = shalt.err (!%p1742_p8)
}
 0x353   :  { %s1746_s10 = scalar_lea.hbm %s1923_s7, 64 }
 0x354   :  { %p1747_p9 = scmp.ne.s32.totalorder %s1923_s7, %s1746_s10  ;;  %p1750_p10 = scmp.lt.u32.totalorder %s1746_s10, %s1923_s7 }
 0x356   :  { %p1752_p11 = pnand %p1750_p10, %p1747_p9 }
 0x358   :  { %1755 = shalt.err (!%p1752_p11)
}
 0x359   :  { %1256 = dma.vmem_to_hbm [thread:$0]  %s1254_s29, 64, %s1923_s7, [#allocation5]  }
 0x35a   :  { %1762 = dma.done.wait [#allocation5], 64  }
 0x35b   :  { %1763 = vsyncadd [#allocation5], 4294967232 }
 0x35c   :  { %1260 = vsyncpa [#allocation4], 1 }
 0x35d   :  { %1261 = vsyncpa [#allocation7], 1 }
 0x35e   :  { %1262 = vsyncpa [#allocation10], 1 }
 0x35f   :  { %1263 = vsyncpa [#allocation5], 1 }

</bundles_post_ra>
